<compile_context>
chip_gen: v7x
topology: tpu7x:2x2x1
jax: 0.10.0
libtpu: 0.0.40
codegen_flags: <defaults>
</compile_context>

<pallas_src>
import functools

import jax
import jax.numpy as jnp
from jax.experimental import pallas as pl
from jax.experimental.pallas import tpu as pltpu

NEG_SLOPE = 0.2
BN_EPS = 1e-5  # nn.BatchNorm2d default eps


def _round_up(x, m):
    return (x + m - 1) // m * m


def _lane_chunks(width):
    """Static (offset, width) 128-lane chunks covering [0, width)."""
    ch = [(j * 128, 128) for j in range(width // 128)]
    if width % 128:
        ch.append(((width // 128) * 128, width % 128))
    return ch


# --------------------- Kernel 1: streaming pooling stats ---------------------
def stats_kernel(x_ref, out_ref, shift_sc, sum_sc, sq_sc, max_sc, *, hw, hw_tile, nk):
    """Stream spatial tiles; keep lane-wise partials in VMEM scratch.

    x_ref   : (row_tile, hw_tile) input tile (rows = flattened N*C, any float dtype)
    out_ref : (row_tile, 3) f32 output block, columns [mean, max, std]; written
              only at finalize (block is resident across the spatial grid axis)
    shift_sc: (row_tile, 128) f32 per-row shift (first spatial element)
    sum_sc / sq_sc / max_sc : (row_tile, 128) f32 lane-wise running sum/sumsq/max
    """
    k = pl.program_id(1)

    @pl.when(k == 0)
    def _():
        # Per-row shift => numerically robust one-pass variance.
        shift_sc[...] = jnp.broadcast_to(
            x_ref[:, 0:1].astype(jnp.float32), shift_sc.shape)
        sum_sc[...] = jnp.zeros_like(sum_sc)
        sq_sc[...] = jnp.zeros_like(sq_sc)
        max_sc[...] = jnp.full_like(max_sc, -jnp.inf)

    def accum(chunks):
        # Fold hw_tile -> 128 lanes with pure-VPU adds/max; no per-step XLU reduce.
        for c0, w in chunks:
            xc = x_ref[:, c0:c0 + w].astype(jnp.float32) - shift_sc[:, :w]
            sum_sc[:, :w] += xc
            sq_sc[:, :w] += xc * xc
            max_sc[:, :w] = jnp.maximum(max_sc[:, :w], xc)

    full_chunks = _lane_chunks(hw_tile)
    rem = hw - (nk - 1) * hw_tile  # valid columns in the last spatial tile (1..hw_tile)
    if rem == hw_tile:
        # Spatial dim tiles exactly: single unconditional path, no masking at all.
        accum(full_chunks)
    else:
        @pl.when(k < nk - 1)
        def _():
            accum(full_chunks)

        @pl.when(k == nk - 1)
        def _():
            # Ragged tail handled with static partial-width slices (no iota/where,
            # no dependence on edge-block padding contents).
            accum(_lane_chunks(rem))

    @pl.when(k == nk - 1)
    def _():
        shift = shift_sc[:, 0:1]
        s = jnp.sum(sum_sc[...], axis=-1, keepdims=True)
        q = jnp.sum(sq_sc[...], axis=-1, keepdims=True)
        mx = jnp.max(max_sc[...], axis=-1, keepdims=True)
        inv_hw = 1.0 / float(hw)
        mean = s * inv_hw + shift
        # Shifted one-pass unbiased variance; clamp against residual cancellation.
        var = jnp.maximum(q - s * s * inv_hw, 0.0) / float(hw - 1)
        out_ref[...] = jnp.concatenate(
            [mean, mx + shift, jnp.sqrt(var)], axis=-1).astype(out_ref.dtype)


# ------------------ Kernel 2: fused block-diagonal grouped MLP ----------------
def mlp_kernel(s_ref, w1_ref, g1_ref, b1_ref, w2_ref, g2_ref, b2_ref, w3_ref,
               out_ref):
    """s (N, 3C) @ blockdiag W1 -> BN -> LReLU -> @W2 -> BN -> LReLU -> @W3."""
    def bn(y, gamma, beta):
        # BatchNorm2d, track_running_stats=False: batch stats, biased variance.
        mu = jnp.mean(y, axis=0, keepdims=True)
        var = jnp.mean((y - mu) * (y - mu), axis=0, keepdims=True)
        return (y - mu) * jax.lax.rsqrt(var + BN_EPS) * gamma + beta

    def lrelu(y):
        return jnp.where(y >= 0, y, NEG_SLOPE * y)

    h = jnp.dot(s_ref[...], w1_ref[...], preferred_element_type=jnp.float32)
    h = lrelu(bn(h, g1_ref[...], b1_ref[...]))
    h = jnp.dot(h, w2_ref[...], preferred_element_type=jnp.float32)
    h = lrelu(bn(h, g2_ref[...], b2_ref[...]))
    # TODO(synk): if per-group widths ever reach >=128, switch these block-diagonal
    # matmuls to three per-group matmuls to avoid 3x MAC/VMEM waste on the MXU.
    out_ref[...] = jnp.dot(h, w3_ref[...],
                           preferred_element_type=jnp.float32).astype(out_ref.dtype)


# -------------------------- One-time param preparation ------------------------
def _block_diag(w):
    """(G, A, B) per-group conv1x1 weights -> block-diagonal (G*A, G*B)."""
    g, a, b = w.shape
    out = jnp.zeros((g * a, g * b), w.dtype)
    for i in range(g):
        out = out.at[i * a:(i + 1) * a, i * b:(i + 1) * b].set(w[i])
    return out


def prepare_mlp_params(params):
    """One-time conversion of per-group conv1x1/BN params into fused matrices.

    W1's rows are permuted to the kernel-1 channel-interleaved stat layout
    (column c*3+g of s_cat is stat g of channel c), so no per-call transpose is
    needed between kernel 1 and kernel 2.
    """
    w1, g1, b1, w2, g2, b2, w3 = params
    ng, cin, _ = w1.shape
    w1bd = _block_diag(w1)                                       # rows = g*cin + c
    perm = jnp.arange(ng * cin).reshape(ng, cin).T.reshape(-1)   # new row p=c*ng+g
    w1p = w1bd[perm]
    return (w1p,
            g1.reshape(1, -1), b1.reshape(1, -1),
            _block_diag(w2),
            g2.reshape(1, -1), b2.reshape(1, -1),
            _block_diag(w3))


# --------------------------------- Wrapper ------------------------------------
def _pick_tiles(r, hw, itemsize, row_tile_max, hw_tile_max):
    """Legal (row_tile, hw_tile) sizes; tuned for megacore + VMEM budget."""
    # Sublane granularity of the input dtype's VMEM tiling.
    sub = 8 if itemsize >= 4 else (16 if itemsize == 2 else 32)
    if r <= sub:
        row_tile = r                      # full dim -> always a legal block shape
    else:
        rmax = max(sub, row_tile_max // sub * sub)
        # >=2 row blocks when possible so the "parallel" row axis shards across
        # v7x's two TensorCores (no effect on single-TC v5e/v6e).
        row_tile = min(rmax, _round_up(-(-r // 2), sub))
    # Keep double-buffered input tiles within a v7x-safe VMEM budget (~24 MiB).
    budget = 24 << 20
    cap = max(128, (budget // (2 * row_tile * itemsize)) // 128 * 128)
    hmax = max(128, min(hw_tile_max, cap) // 128 * 128)
    hw_tile = hw if hw <= hmax else hmax  # full dim (legal) or a 128-multiple tile
    return row_tile, hw_tile


def channels_pool(x, mlp_params, *, out_layers, row_tile_max=512, hw_tile_max=2048):
    """x: (N, C, H, W), float32 or bfloat16. Returns (N, 3*out_layers, 1, 1) f32."""
    n, c, h, w = x.shape
    hw = h * w
    assert hw > 1, "torch.std (unbiased) requires H*W > 1"
    r = n * c

    # (N, C, H, W) -> (N*C, H*W): contiguous reshape; no copy, no cast, no pad.
    x_flat = x.reshape(r, hw)
    itemsize = x_flat.dtype.itemsize
    row_tile, hw_tile = _pick_tiles(r, hw, itemsize, row_tile_max, hw_tile_max)

    n_rows = -(-r // row_tile)
    nk = -(-hw // hw_tile)

    in_tile_bytes = row_tile * hw_tile * itemsize
    scratch_bytes = 4 * row_tile * 128 * 4
    vmem_limit = int(min(48 << 20,
                         max(16 << 20, 2 * in_tile_bytes + scratch_bytes + (4 << 20))))

    stats = pl.pallas_call(
        functools.partial(stats_kernel, hw=hw, hw_tile=hw_tile, nk=nk),
        grid=(n_rows, nk),
        in_specs=[pl.BlockSpec((row_tile, hw_tile), lambda i, k: (i, k))],
        out_specs=pl.BlockSpec((row_tile, 3), lambda i, k: (i, 0)),
        out_shape=jax.ShapeDtypeStruct((r, 3), jnp.float32),
        scratch_shapes=[pltpu.VMEM((row_tile, 128), jnp.float32)] * 4,
        compiler_params=pltpu.CompilerParams(
            dimension_semantics=("parallel", "arbitrary"),
            vmem_limit_bytes=vmem_limit),
    )(x_flat)

    # (N*C, 3) -> (N, 3C) channel-interleaved [c0:(avg,max,std), c1:...]; free reshape.
    s_cat = stats.reshape(n, 3 * c)

    w1p, g1, b1, w2bd, g2, b2, w3bd = mlp_params
    vmem = pl.BlockSpec(memory_space=pltpu.MemorySpace.VMEM)
    out = pl.pallas_call(
        mlp_kernel,
        out_shape=jax.ShapeDtypeStruct((n, 3 * out_layers), jnp.float32),
        in_specs=[vmem] * 8,
        out_specs=vmem,
    )(s_cat, w1p, g1, b1, w2bd, g2, b2, w3bd)
    return out.reshape(n, 3 * out_layers, 1, 1)


# ------------------------------ Params & reference -----------------------------
def init_params(key, in_channels, hidden_layers, out_layers, n_groups=3):
    """Per-group conv1x1 weights stored pre-transposed: (G, in_per_grp, out_per_grp)."""
    k1, k2, k3, k4, k5, k6, k7 = jax.random.split(key, 7)
    w1 = 0.2 * jax.random.normal(k1, (n_groups, in_channels, hidden_layers), jnp.float32)
    w2 = 0.2 * jax.random.normal(k2, (n_groups, hidden_layers, hidden_layers), jnp.float32)
    w3 = 0.2 * jax.random.normal(k3, (n_groups, hidden_layers, out_layers), jnp.float32)
    g1 = 1.0 + 0.1 * jax.random.normal(k4, (n_groups, 1, hidden_layers), jnp.float32)
    b1 = 0.1 * jax.random.normal(k5, (n_groups, 1, hidden_layers), jnp.float32)
    g2 = 1.0 + 0.1 * jax.random.normal(k6, (n_groups, 1, hidden_layers), jnp.float32)
    b2 = 0.1 * jax.random.normal(k7, (n_groups, 1, hidden_layers), jnp.float32)
    return (w1, g1, b1, w2, g2, b2, w3)


def reference_jax(x, params, *, out_layers):
    """Pure-JAX reference with identical semantics (two-pass std, per-group MLP)."""
    w1, g1, b1, w2, g2, b2, w3 = params
    n, c, h, w = x.shape
    xf = x.reshape(n, c, h * w).astype(jnp.float32)
    mean = jnp.mean(xf, axis=-1)
    mx = jnp.max(xf, axis=-1)
    std = jnp.sqrt(jnp.sum((xf - mean[:, :, None]) ** 2, axis=-1) / (h * w - 1))
    stats = (mean, mx, std)

    def bn(y, gamma, beta):
        mu = jnp.mean(y, axis=0, keepdims=True)
        var = jnp.mean((y - mu) ** 2, axis=0, keepdims=True)
        return (y - mu) * jax.lax.rsqrt(var + BN_EPS) * gamma + beta

    def lrelu(y):
        return jnp.where(y >= 0, y, NEG_SLOPE * y)

    outs = []
    for g in range(3):
        hdd = jnp.dot(stats[g], w1[g])
        hdd = lrelu(bn(hdd, g1[g], b1[g]))
        hdd = jnp.dot(hdd, w2[g])
        hdd = lrelu(bn(hdd, g2[g], b2[g]))
        outs.append(jnp.dot(hdd, w3[g]))
    return jnp.concatenate(outs, axis=-1).reshape(n, 3 * out_layers, 1, 1)


if __name__ == "__main__":
    key = jax.random.PRNGKey(0)
    HIDDEN, OUT = 8, 2

    # Test 1: module-consistent small shapes (batch=2, channels=4, 16x16), single tile.
    N, C, H, W = 2, 4, 16, 16
    kx, kp, key = jax.random.split(key, 3)
    x = jax.random.normal(kx, (N, C, H, W), jnp.float32)
    raw = init_params(kp, C, HIDDEN, OUT)
    params = prepare_mlp_params(raw)
    out = jax.block_until_ready(channels_pool(x, params, out_layers=OUT))
    ref = jax.block_until_ready(reference_jax(x, raw, out_layers=OUT))
    assert out.shape == (N, 3 * OUT, 1, 1), out.shape
    assert jnp.allclose(out, ref, rtol=2e-3, atol=2e-3)

    # Test 2: multiple ragged row blocks, multiple spatial tiles with a ragged tail,
    # nonzero mean (exercises the shifted one-pass variance path).
    N2, C2, H2, W2 = 3, 10, 40, 40
    kx2, kp2, key = jax.random.split(key, 3)
    x2 = 3.0 + jax.random.normal(kx2, (N2, C2, H2, W2), jnp.float32)
    raw2 = init_params(kp2, C2, HIDDEN, OUT)
    params2 = prepare_mlp_params(raw2)
    out2 = jax.block_until_ready(
        channels_pool(x2, params2, out_layers=OUT, row_tile_max=16, hw_tile_max=512))
    ref2 = jax.block_until_ready(reference_jax(x2, raw2, out_layers=OUT))
    assert out2.shape == (N2, 3 * OUT, 1, 1), out2.shape
    assert jnp.allclose(out2, ref2, rtol=2e-3, atol=2e-3)

    # Test 3: bfloat16 streaming input (half the HBM bytes), f32 accumulation in-kernel.
    N3, C3, H3, W3 = 4, 8, 24, 24
    kx3, kp3, key = jax.random.split(key, 3)
    x3 = jax.random.normal(kx3, (N3, C3, H3, W3), jnp.float32).astype(jnp.bfloat16)
    raw3 = init_params(kp3, C3, HIDDEN, OUT)
    params3 = prepare_mlp_params(raw3)
    out3 = jax.block_until_ready(channels_pool(x3, params3, out_layers=OUT))
    ref3 = jax.block_until_ready(
        reference_jax(x3.astype(jnp.float32), raw3, out_layers=OUT))
    assert out3.shape == (N3, 3 * OUT, 1, 1), out3.shape
    assert jnp.allclose(out3, ref3, rtol=1e-2, atol=1e-2)

    print("KERNEL_OK")
</pallas_src>

<mosaic_0001>
module attributes {stable_mosaic.version = 11 : i64} {
  func.func @stats_kernel(%arg0: i32, %arg1: i32, %arg2: memref<8x256xf32, #tpu.memory_space<vmem>>, %arg3: memref<8x3xf32, #tpu.memory_space<vmem>>, %arg4: memref<8x128xf32, #tpu.memory_space<vmem>>, %arg5: memref<8x128xf32, #tpu.memory_space<vmem>>, %arg6: memref<8x128xf32, #tpu.memory_space<vmem>>, %arg7: memref<8x128xf32, #tpu.memory_space<vmem>>) attributes {dimension_semantics = [#tpu.dimension_semantics<parallel>, #tpu.dimension_semantics<arbitrary>], iteration_bounds = array<i64: 1, 1>, scalar_prefetch = 0 : i64, scratch_operands = 4 : i64, tpu.core_type = #tpu.core_type<tc>, window_params = [{transform_indices = @transform_0, window_bounds = array<i64: 8, 256>}, {transform_indices = @transform_1, window_bounds = array<i64: 8, 3>}]} {
    %c0_i32 = arith.constant 0 : i32
    %0 = arith.cmpi eq, %arg1, %c0_i32 : i32
    %1 = arith.extui %0 : i1 to i32
    %c0_i32_0 = arith.constant 0 : i32
    %2 = arith.cmpi ne, %1, %c0_i32_0 : i32
    scf.if %2 {
      %c0_33 = arith.constant 0 : index
      %c0_34 = arith.constant 0 : index
      %32 = vector.load %arg2[%c0_33, %c0_34] : memref<8x256xf32, #tpu.memory_space<vmem>>, vector<8x1xf32>
      %33 = vector.shape_cast %32 : vector<8x1xf32> to vector<8x1xf32>
      %34 = vector.broadcast %33 : vector<8x1xf32> to vector<8x128xf32>
      %c0_35 = arith.constant 0 : index
      %c0_36 = arith.constant 0 : index
      %35 = vector.load %arg4[%c0_35, %c0_36] : memref<8x128xf32, #tpu.memory_space<vmem>>, vector<8x128xf32>
      tpu.vector_store %arg4[%c0_35, %c0_36], %34 {strides = array<i32>} : memref<8x128xf32, #tpu.memory_space<vmem>>, vector<8x128xf32>,
      %cst = arith.constant 0.000000e+00 : f32
      %36 = vector.broadcast %cst : f32 to vector<8x128xf32>
      %c0_37 = arith.constant 0 : index
      %c0_38 = arith.constant 0 : index
      %37 = vector.load %arg5[%c0_37, %c0_38] : memref<8x128xf32, #tpu.memory_space<vmem>>, vector<8x128xf32>
      tpu.vector_store %arg5[%c0_37, %c0_38], %36 {strides = array<i32>} : memref<8x128xf32, #tpu.memory_space<vmem>>, vector<8x128xf32>,
      %cst_39 = arith.constant 0.000000e+00 : f32
      %38 = vector.broadcast %cst_39 : f32 to vector<8x128xf32>
      %c0_40 = arith.constant 0 : index
      %c0_41 = arith.constant 0 : index
      %39 = vector.load %arg6[%c0_40, %c0_41] : memref<8x128xf32, #tpu.memory_space<vmem>>, vector<8x128xf32>
      tpu.vector_store %arg6[%c0_40, %c0_41], %38 {strides = array<i32>} : memref<8x128xf32, #tpu.memory_space<vmem>>, vector<8x128xf32>,
      %cst_42 = arith.constant 0xFF800000 : f32
      %40 = vector.broadcast %cst_42 : f32 to vector<8x128xf32>
      %c0_43 = arith.constant 0 : index
      %c0_44 = arith.constant 0 : index
      %41 = vector.load %arg7[%c0_43, %c0_44] : memref<8x128xf32, #tpu.memory_space<vmem>>, vector<8x128xf32>
      tpu.vector_store %arg7[%c0_43, %c0_44], %40 {strides = array<i32>} : memref<8x128xf32, #tpu.memory_space<vmem>>, vector<8x128xf32>,
    } else {
    }
    %c0 = arith.constant 0 : index
    %c0_1 = arith.constant 0 : index
    %3 = vector.load %arg2[%c0, %c0_1] : memref<8x256xf32, #tpu.memory_space<vmem>>, vector<8x128xf32>
    %c0_2 = arith.constant 0 : index
    %c0_3 = arith.constant 0 : index
    %4 = vector.load %arg4[%c0_2, %c0_3] : memref<8x128xf32, #tpu.memory_space<vmem>>, vector<8x128xf32>
    %5 = arith.subf %3, %4 : vector<8x128xf32>
    %c0_4 = arith.constant 0 : index
    %c0_5 = arith.constant 0 : index
    %6 = vector.load %arg5[%c0_4, %c0_5] : memref<8x128xf32, #tpu.memory_space<vmem>>, vector<8x128xf32>
    %7 = arith.addf %6, %5 : vector<8x128xf32>
    %c0_6 = arith.constant 0 : index
    %c0_7 = arith.constant 0 : index
    %8 = vector.load %arg5[%c0_6, %c0_7] : memref<8x128xf32, #tpu.memory_space<vmem>>, vector<8x128xf32>
    tpu.vector_store %arg5[%c0_6, %c0_7], %7 {strides = array<i32>} : memref<8x128xf32, #tpu.memory_space<vmem>>, vector<8x128xf32>,
    %c0_8 = arith.constant 0 : index
    %c0_9 = arith.constant 0 : index
    %9 = vector.load %arg6[%c0_8, %c0_9] : memref<8x128xf32, #tpu.memory_space<vmem>>, vector<8x128xf32>
    %10 = arith.mulf %5, %5 : vector<8x128xf32>
    %11 = arith.addf %9, %10 : vector<8x128xf32>
    %c0_10 = arith.constant 0 : index
    %c0_11 = arith.constant 0 : index
    %12 = vector.load %arg6[%c0_10, %c0_11] : memref<8x128xf32, #tpu.memory_space<vmem>>, vector<8x128xf32>
    tpu.vector_store %arg6[%c0_10, %c0_11], %11 {strides = array<i32>} : memref<8x128xf32, #tpu.memory_space<vmem>>, vector<8x128xf32>,
    %c0_12 = arith.constant 0 : index
    %c0_13 = arith.constant 0 : index
    %13 = vector.load %arg7[%c0_12, %c0_13] : memref<8x128xf32, #tpu.memory_space<vmem>>, vector<8x128xf32>
    %14 = arith.maximumf %13, %5 : vector<8x128xf32>
    %c0_14 = arith.constant 0 : index
    %c0_15 = arith.constant 0 : index
    %15 = vector.load %arg7[%c0_14, %c0_15] : memref<8x128xf32, #tpu.memory_space<vmem>>, vector<8x128xf32>
    tpu.vector_store %arg7[%c0_14, %c0_15], %14 {strides = array<i32>} : memref<8x128xf32, #tpu.memory_space<vmem>>, vector<8x128xf32>,
    %c0_16 = arith.constant 0 : index
    %c128 = arith.constant 128 : index
    %16 = vector.load %arg2[%c0_16, %c128] : memref<8x256xf32, #tpu.memory_space<vmem>>, vector<8x128xf32>
    %c0_17 = arith.constant 0 : index
    %c0_18 = arith.constant 0 : index
    %17 = vector.load %arg4[%c0_17, %c0_18] : memref<8x128xf32, #tpu.memory_space<vmem>>, vector<8x128xf32>
    %18 = arith.subf %16, %17 : vector<8x128xf32>
    %c0_19 = arith.constant 0 : index
    %c0_20 = arith.constant 0 : index
    %19 = vector.load %arg5[%c0_19, %c0_20] : memref<8x128xf32, #tpu.memory_space<vmem>>, vector<8x128xf32>
    %20 = arith.addf %19, %18 : vector<8x128xf32>
    %c0_21 = arith.constant 0 : index
    %c0_22 = arith.constant 0 : index
    %21 = vector.load %arg5[%c0_21, %c0_22] : memref<8x128xf32, #tpu.memory_space<vmem>>, vector<8x128xf32>
    tpu.vector_store %arg5[%c0_21, %c0_22], %20 {strides = array<i32>} : memref<8x128xf32, #tpu.memory_space<vmem>>, vector<8x128xf32>,
    %c0_23 = arith.constant 0 : index
    %c0_24 = arith.constant 0 : index
    %22 = vector.load %arg6[%c0_23, %c0_24] : memref<8x128xf32, #tpu.memory_space<vmem>>, vector<8x128xf32>
    %23 = arith.mulf %18, %18 : vector<8x128xf32>
    %24 = arith.addf %22, %23 : vector<8x128xf32>
    %c0_25 = arith.constant 0 : index
    %c0_26 = arith.constant 0 : index
    %25 = vector.load %arg6[%c0_25, %c0_26] : memref<8x128xf32, #tpu.memory_space<vmem>>, vector<8x128xf32>
    tpu.vector_store %arg6[%c0_25, %c0_26], %24 {strides = array<i32>} : memref<8x128xf32, #tpu.memory_space<vmem>>, vector<8x128xf32>,
    %c0_27 = arith.constant 0 : index
    %c0_28 = arith.constant 0 : index
    %26 = vector.load %arg7[%c0_27, %c0_28] : memref<8x128xf32, #tpu.memory_space<vmem>>, vector<8x128xf32>
    %27 = arith.maximumf %26, %18 : vector<8x128xf32>
    %c0_29 = arith.constant 0 : index
    %c0_30 = arith.constant 0 : index
    %28 = vector.load %arg7[%c0_29, %c0_30] : memref<8x128xf32, #tpu.memory_space<vmem>>, vector<8x128xf32>
    tpu.vector_store %arg7[%c0_29, %c0_30], %27 {strides = array<i32>} : memref<8x128xf32, #tpu.memory_space<vmem>>, vector<8x128xf32>,
    %c0_i32_31 = arith.constant 0 : i32
    %29 = arith.cmpi eq, %arg1, %c0_i32_31 : i32
    %30 = arith.extui %29 : i1 to i32
    %c0_i32_32 = arith.constant 0 : i32
    %31 = arith.cmpi ne, %30, %c0_i32_32 : i32
    scf.if %31 {
      %c0_33 = arith.constant 0 : index
      %c0_34 = arith.constant 0 : index
      %32 = vector.load %arg4[%c0_33, %c0_34] : memref<8x128xf32, #tpu.memory_space<vmem>>, vector<8x1xf32>
      %c0_35 = arith.constant 0 : index
      %c0_36 = arith.constant 0 : index
      %33 = vector.load %arg5[%c0_35, %c0_36] : memref<8x128xf32, #tpu.memory_space<vmem>>, vector<8x128xf32>
      %cst = arith.constant dense<0.000000e+00> : vector<8xf32>
      %34 = vector.multi_reduction <add>, %33, %cst [1] : vector<8x128xf32> to vector<8xf32>
      %35 = vector.shape_cast %34 : vector<8xf32> to vector<8x1xf32>
      %c0_37 = arith.constant 0 : index
      %c0_38 = arith.constant 0 : index
      %36 = vector.load %arg6[%c0_37, %c0_38] : memref<8x128xf32, #tpu.memory_space<vmem>>, vector<8x128xf32>
      %cst_39 = arith.constant dense<0.000000e+00> : vector<8xf32>
      %37 = vector.multi_reduction <add>, %36, %cst_39 [1] : vector<8x128xf32> to vector<8xf32>
      %38 = vector.shape_cast %37 : vector<8xf32> to vector<8x1xf32>
      %c0_40 = arith.constant 0 : index
      %c0_41 = arith.constant 0 : index
      %39 = vector.load %arg7[%c0_40, %c0_41] : memref<8x128xf32, #tpu.memory_space<vmem>>, vector<8x128xf32>
      %cst_42 = arith.constant dense<0xFF800000> : vector<8xf32>
      %40 = vector.multi_reduction <maximumf>, %39, %cst_42 [1] : vector<8x128xf32> to vector<8xf32>
      %41 = vector.shape_cast %40 : vector<8xf32> to vector<8x1xf32>
      %cst_43 = arith.constant 3.906250e-03 : f32
      %42 = vector.broadcast %cst_43 : f32 to vector<8x1xf32>
      %43 = arith.mulf %35, %42 : vector<8x1xf32>
      %44 = arith.addf %43, %32 : vector<8x1xf32>
      %45 = arith.mulf %35, %35 : vector<8x1xf32>
      %cst_44 = arith.constant 3.906250e-03 : f32
      %46 = vector.broadcast %cst_44 : f32 to vector<8x1xf32>
      %47 = arith.mulf %45, %46 : vector<8x1xf32>
      %48 = arith.subf %38, %47 : vector<8x1xf32>
      %cst_45 = arith.constant 0.000000e+00 : f32
      %49 = vector.broadcast %cst_45 : f32 to vector<8x1xf32>
      %50 = arith.maximumf %48, %49 : vector<8x1xf32>
      %cst_46 = arith.constant 2.550000e+02 : f32
      %51 = vector.broadcast %cst_46 : f32 to vector<8x1xf32>
      %52 = arith.divf %50, %51 : vector<8x1xf32>
      %53 = arith.addf %41, %32 : vector<8x1xf32>
      %54 = math.sqrt %52 : vector<8x1xf32>
      %55 = tpu.concatenate %44, %53, %54 in 1 : vector<8x1xf32>, vector<8x1xf32>, vector<8x1xf32> -> vector<8x3xf32>
      %c0_47 = arith.constant 0 : index
      %c0_48 = arith.constant 0 : index
      %56 = vector.load %arg3[%c0_47, %c0_48] : memref<8x3xf32, #tpu.memory_space<vmem>>, vector<8x3xf32>
      tpu.vector_store %arg3[%c0_47, %c0_48], %55 {strides = array<i32>} : memref<8x3xf32, #tpu.memory_space<vmem>>, vector<8x3xf32>,
    } else {
    }
    return
  }
  func.func @transform_0(%arg0: i32, %arg1: i32) -> (i32, i32) {
    %c0_i32 = arith.constant 0 : i32
    return %arg0, %arg1 : i32, i32
  }
  func.func @transform_1(%arg0: i32, %arg1: i32) -> (i32, i32) {
    %c0_i32 = arith.constant 0 : i32
    %c0_i32_0 = arith.constant 0 : i32
    return %arg0, %c0_i32 : i32, i32
  }
}

</mosaic_0001>

<bundles_post_ra>
// kernel: tpu_custom_call.1
= control target key start
LH: loop header
LB: loop body
LE: loop exit
PB: predicated region body
PF: predicated region fallthrough
CT: control target
= control target key end

     0   :  { %6 = vsyncpa [#allocation7], 0  ;;  %s134_s6 = smov [#allocation6]   ;;  %s162_s0 = inlined_call_operand.hbm [shape: f32[8,256], index: 0, kind: input, shape index: {}]   ;;  %s163_s1 = inlined_call_operand.vmem [shape: f32[8,3], index: 1, kind: output, shape index: {}]  }
   0x1   :  { %s13_s7 = sshll.u32 %s134_s6, 4  ;;  %s110_s10 = scalar_lea.hbm %s162_s0, 256  ;;  %s14_s7 = int_to_ptr.vmem [resolvable:$true] %s13_s7 }
   0x2   :  { %p111_p0 = scmp.ne.s32.totalorder %s162_s0, %s110_s10  ;;  %p114_p1 = scmp.lt.u32.totalorder %s110_s10, %s162_s0 }
   0x4   :  { %p116_p2 = pnand %p114_p1, %p111_p0 }
   0x6   :  { %119 = shalt.err (!%p116_p2)
}
   0x7   :  { %s120_s15 = scalar_lea.vmem %s14_s7, 256  ;;  %p125_p4 = scmp.lt.s32.totalorder %s14_s7, %s14_s7 }
   0x8   :  { %p121_p3 = scmp.ne.s32.totalorder %s14_s7, %s120_s15  ;;  %p126_p5 = scmp.lt.s32.totalorder %s120_s15, %s120_s15 }
   0xa   :  { %p127_p6 = por %p126_p5, %p125_p4 }
   0xc   :  { %p128_p7 = pnand %p127_p6, %p121_p3 }
   0xe   :  { %131 = shalt.err (!%p128_p7)
}
   0xf   :  { %16 = dma.hbm_to_vmem [thread:$0]  %s162_s0, 256, %s14_s7, [#allocation7]  }
  0x10   :  { %132 = dma.done.wait [#allocation7], 256  }
  0x11   :  { %133 = vsyncadd [#allocation7], 4294967040  ;;  %v135_v0 = vmov 0   ;;  %v24_v1 = vld [vmem:[#allocation6] sm:$0xff]  ;;  %v47_v2 = vld [vmem:[#allocation6 + $0x8] sm:$0xff]  ;;  %s136_s0 = smov 1  }
  0x12   :  { %107 = vset.pattern.permute.xlu0 %v135_v0  ;;  %vm93_vm1 = vcmask 7168   ;;  %vm95_vm2 = vcmask 15360   ;;  %vm97_vm4 = vcmask 23552  }
  0x13   :  { %27 = vperm.xlu0 %107, %v24_v1  }
  0x92   :  { %v28_v3 = vpop.permute.xlu0 %27 }
  0x93   :  { %v36_v4 = vsub.f32 %v24_v1, %v28_v3  ;;  %v49_v5 = vsub.f32 %v47_v2, %v28_v3 }
  0x95   :  { %v58_v6 = vmax.f32 %v36_v4, %v49_v5  ;;  %v51_v7 = vadd.f32 %v49_v5, %v36_v4  ;;  %v41_v8 = vmul.f32 %v36_v4, %v36_v4  ;;  %v54_v9 = vmul.f32 %v49_v5, %v49_v5 }
  0x97   :  { %71 = vmax.xlane.f32.xlu0 %v58_v6  ;;  %65 = vadd.xlane.f32.xlu1 %v51_v7  ;;  %v55_v10 = vadd.f32 %v54_v9, %v41_v8 }
  0x9b   :  { %68 = vadd.xlane.f32.xlu1 %v55_v10 }
 0x124   :  { %v72_v11 = vpop.xlane.xlu0 %71  ;;  %v66_v13 = vpop.xlane.xlu1 %65 }
 0x125   :  { %v81_v12 = vadd.f32 %v72_v11, %v28_v3  ;;  %v75_v14 = vmul.f32 %v66_v13, %v66_v13  ;;  %v73_v22 = vmul.f32 0.00390625, %v66_v13 }
 0x127   :  { %90 = vrot.lane.b32.xlu1 %v81_v12, %s136_s0  ;;  %v76_v15 = vmul.f32 0.00390625, %v75_v14  ;;  %v74_v24 = vadd.f32 %v73_v22, %v28_v3 }
 0x128   :  { %v69_v16 = vpop.xlane.xlu1 %68 }
 0x129   :  { %v77_v17 = vsub.f32 %v69_v16, %v76_v15 }
 0x12b   :  { %v78_v18 = vmax.f32 %v77_v17, 0.0 }
 0x12d   :  { %v80_v19 = vmul.f32 0.003921569, %v78_v18 }
 0x12f   :  { %108 = vrsqrt.f32 %v80_v19  ;;  %vm84_vm0 = vcmp.eq.f32.partialorder %v80_v19, inf  ;;  %v87_v25 = vand.u32 2147483648, %v80_v19  ;;  %vm86_vm3 = vcmp.eq.f32.partialorder %v80_v19, 0.0 }
 0x139   :  { %v109_v20 = vpop.eup %108 }
 0x13a   :  { %v83_v21 = vmul.f32 %v109_v20, %v80_v19 }
 0x13c   :  { %v85_v23 = vsel %vm84_vm0, %v80_v19, %v83_v21 }
 0x13d   :  { %v88_v27 = vsel %vm86_vm3, %v87_v25, %v85_v23 }
 0x199   :  { %v91_v26 = vpop.permute.xlu1 %90 }
 0x19a   :  { %v94_v28 = vsel %vm93_vm1, %v74_v24, %v91_v26 }
 0x19b   :  { %v96_v29 = vsel %vm95_vm2, %v94_v28, %v88_v27 }
 0x19c   :  { %98 = vst.msk [vmem:[%s163_s1] sm:$0xff] %vm97_vm4, %v96_v29 }
 0x19d   :  { %103 = vsyncpa [#allocation7], 1 }

</bundles_post_ra>
